<compile_context>
chip_gen: v7x
topology: tpu7x:2x2x1
jax: 0.10.0
libtpu: 0.0.40
codegen_flags: <defaults>
</compile_context>

<pallas_src>
import math

import jax
import jax.numpy as jnp
from jax.experimental import pallas as pl
from jax.experimental.pallas import tpu as pltpu

HIDDEN = 128            # trunk width of the PyTorch module
SUBLANE = 8             # f32 sublane count
DEFAULT_TILE_B = 1024   # batch tile (review: sweep 512-2048; 1024 is a safe default)


def _round_up(x, m):
    return (x + m - 1) // m * m


# ---------------------------------------------------------------------------
# Kernel: one trunk matmul + fused bias/ReLU, one narrow head matmul.
# ---------------------------------------------------------------------------
def actor_critic_kernel(x_ref, wt_ref, wh_ref, b_ref, out_ref):
    W = wh_ref.shape[-1]                            # narrow head width (e.g. 8)
    x = x_ref[...]                                  # (Bt, D)

    b_trunk = b_ref[0:1, :]                         # (1, 256)
    b_head = b_ref[1:2, 0:W]                        # (1, W)

    # Fused actor/critic trunk: relu(x @ [Wpi1 | Wv1] + [bpi1 | bv1])
    h = jnp.dot(x, wt_ref[...], preferred_element_type=jnp.float32) + b_trunk
    h = jnp.maximum(h, 0.0)                         # (Bt, 256) = [h_pi | h_v]

    # Fused heads: block-diagonal weight maps h_pi -> pi cols, h_v -> v col.
    out_ref[...] = (
        jnp.dot(h, wh_ref[...], preferred_element_type=jnp.float32) + b_head
    )                                               # (Bt, W) narrow output


def _cost_estimate(Bp, D, W, wt, wh, b):
    flops = 2 * Bp * (D * 2 * HIDDEN + 2 * HIDDEN * W)
    bytes_accessed = 4 * (Bp * D + int(wt.size) + int(wh.size) + int(b.size) + Bp * W)
    return pl.CostEstimate(flops=flops, transcendentals=0,
                           bytes_accessed=bytes_accessed)


# ---------------------------------------------------------------------------
# Wrapper
# ---------------------------------------------------------------------------
def actor_critic_forward(state, packed, n_actions, *, tile_b=DEFAULT_TILE_B):
    """Fused ActorCritic forward.

    state:  (B, input_dims) float32
    packed: dict from pack_params()
    returns (pi, v) with shapes (B, n_actions), (B, 1)
    """
    B, D = state.shape
    wt = packed["w_trunk"]        # (D, 256)
    wh = packed["w_head"]         # (256, W), block-diagonal, zero-padded
    b = packed["biases"]          # (2, 256)
    W = wh.shape[-1]

    Bp0 = _round_up(B, SUBLANE)   # every vreg row occupied

    if Bp0 <= SUBLANE:
        # Tiny serving path (B <= 8): launch/DMA-latency bound, single block.
        Bp = Bp0
        if Bp != B:
            state = jnp.pad(state, ((0, Bp - B), (0, 0)))
        vmem = pl.BlockSpec(memory_space=pltpu.MemorySpace.VMEM)
        out = pl.pallas_call(
            actor_critic_kernel,
            out_shape=jax.ShapeDtypeStruct((Bp, W), jnp.float32),
            in_specs=[vmem] * 4,
            out_specs=vmem,
            cost_estimate=_cost_estimate(Bp, D, W, wt, wh, b),
        )(state, wt, wh, b)
    else:
        # Tiled, pipelined path for every non-tiny batch.
        #   * cap the tile at ceil(Bp/2) -> grid always has >= 2 parallel
        #     steps (v7x megacore sharding).
        #   * pad Bp up to a tile multiple so ragged batches never fall back
        #     to the unpipelined single-block path.
        tb = min(tile_b, _round_up((Bp0 + 1) // 2, SUBLANE))
        tb = max(tb, SUBLANE)
        Bp = _round_up(Bp0, tb)
        if Bp != B:
            state = jnp.pad(state, ((0, Bp - B), (0, 0)))

        out = pl.pallas_call(
            actor_critic_kernel,
            out_shape=jax.ShapeDtypeStruct((Bp, W), jnp.float32),
            grid=(Bp // tb,),
            in_specs=[
                pl.BlockSpec((tb, D), lambda i: (i, 0)),
                pl.BlockSpec((D, 2 * HIDDEN), lambda i: (0, 0)),
                pl.BlockSpec((2 * HIDDEN, W), lambda i: (0, 0)),
                pl.BlockSpec((2, 2 * HIDDEN), lambda i: (0, 0)),
            ],
            out_specs=pl.BlockSpec((tb, W), lambda i: (i, 0)),
            compiler_params=pltpu.CompilerParams(
                dimension_semantics=("parallel",)),
            cost_estimate=_cost_estimate(Bp, D, W, wt, wh, b),
        )(state, wt, wh, b)

    pi = out[:B, :n_actions]
    v = out[:B, n_actions:n_actions + 1]
    return pi, v


# ---------------------------------------------------------------------------
# Parameter init (mimics PyTorch nn.Linear U(-1/sqrt(fan_in), +)) and packing
# ---------------------------------------------------------------------------
def init_params(key, input_dims, n_actions, hidden=HIDDEN):
    ks = jax.random.split(key, 8)

    def linear(kw, kb, fan_in, fan_out):
        bound = 1.0 / math.sqrt(fan_in)
        w = jax.random.uniform(kw, (fan_in, fan_out), jnp.float32, -bound, bound)
        b = jax.random.uniform(kb, (1, fan_out), jnp.float32, -bound, bound)
        return w, b

    wpi1, bpi1 = linear(ks[0], ks[1], input_dims, hidden)
    wv1, bv1 = linear(ks[2], ks[3], input_dims, hidden)
    wpi, bpi = linear(ks[4], ks[5], hidden, n_actions)
    wv, bv = linear(ks[6], ks[7], hidden, 1)
    return dict(wpi1=wpi1, bpi1=bpi1, wv1=wv1, bv1=bv1,
                wpi=wpi, bpi=bpi, wv=wv, bv=bv)


def pack_params(p, n_actions, hidden=HIDDEN):
    """Packs the 8 Linear tensors into 3 kernel operands (narrow head)."""
    # Narrow fused-head width: pi columns + 1 value column, padded to the
    # sublane multiple. For n_actions=4 this is 8 (32 B/row writeback).
    W = _round_up(n_actions + 1, SUBLANE)

    # Fused trunk weight / bias: [Wpi1 | Wv1], [bpi1 | bv1]
    w_trunk = jnp.concatenate([p["wpi1"], p["wv1"]], axis=1)        # (D, 256)

    # Block-diagonal fused head weight, zero-padded to W lanes:
    #   rows 0..127   (h_pi) -> columns [0, n_actions)        = Wpi
    #   rows 128..255 (h_v)  -> column  n_actions             = Wv
    w_head = jnp.zeros((2 * hidden, W), jnp.float32)
    w_head = w_head.at[:hidden, :n_actions].set(p["wpi"])
    w_head = w_head.at[hidden:, n_actions:n_actions + 1].set(p["wv"])

    # All biases in one (2, 256) array: row 0 = trunk bias, row 1 = head bias.
    biases = jnp.zeros((2, 2 * hidden), jnp.float32)
    biases = biases.at[0, :].set(
        jnp.concatenate([p["bpi1"], p["bv1"]], axis=1)[0])
    biases = biases.at[1, :n_actions].set(p["bpi"][0])
    biases = biases.at[1, n_actions].set(p["bv"][0, 0])

    return dict(w_trunk=w_trunk, w_head=w_head, biases=biases)


def reference_forward(state, p):
    """Pure-JAX reference matching the PyTorch module's forward()."""
    pi1 = jnp.maximum(state @ p["wpi1"] + p["bpi1"], 0.0)
    v1 = jnp.maximum(state @ p["wv1"] + p["bv1"], 0.0)
    pi = pi1 @ p["wpi"] + p["bpi"]
    v = v1 @ p["wv"] + p["bv"]
    return pi, v


if __name__ == "__main__":
    # Small shapes consistent with the module: input_dims=(8,), n_actions=4.
    B, INPUT_DIMS, N_ACTIONS = 2, 8, 4

    key = jax.random.PRNGKey(0)
    k_state, k_params = jax.random.split(key)

    state = jax.random.normal(k_state, (B, INPUT_DIMS), dtype=jnp.float32)
    params = init_params(k_params, INPUT_DIMS, N_ACTIONS)
    packed = pack_params(params, N_ACTIONS)

    # Tiny serving path (grid=()).
    pi, v = jax.block_until_ready(actor_critic_forward(state, packed, N_ACTIONS))
    pi_ref, v_ref = reference_forward(state, params)
    assert pi.shape == (B, N_ACTIONS) and v.shape == (B, 1)
    assert jnp.allclose(pi, pi_ref, atol=1e-5, rtol=1e-5)
    assert jnp.allclose(v, v_ref, atol=1e-5, rtol=1e-5)

    # Tiled / megacore path: tile_b=1024, grid=(4,), >=2 parallel steps.
    B_big = 4096
    state_big = jax.random.normal(jax.random.PRNGKey(1), (B_big, INPUT_DIMS),
                                  dtype=jnp.float32)
    pi_b, v_b = jax.block_until_ready(
        actor_critic_forward(state_big, packed, N_ACTIONS))
    pi_b_ref, v_b_ref = reference_forward(state_big, params)
    assert jnp.allclose(pi_b, pi_b_ref, atol=1e-5, rtol=1e-5)
    assert jnp.allclose(v_b, v_b_ref, atol=1e-5, rtol=1e-5)

    # Ragged batch that is NOT a tile multiple: padded to a tile multiple and
    # still routed through the tiled, pipelined path (no single-block fallback).
    B_odd = 600
    state_odd = jax.random.normal(jax.random.PRNGKey(2), (B_odd, INPUT_DIMS),
                                  dtype=jnp.float32)
    pi_o, v_o = jax.block_until_ready(
        actor_critic_forward(state_odd, packed, N_ACTIONS, tile_b=256))
    pi_o_ref, v_o_ref = reference_forward(state_odd, params)
    assert pi_o.shape == (B_odd, N_ACTIONS) and v_o.shape == (B_odd, 1)
    assert jnp.allclose(pi_o, pi_o_ref, atol=1e-5, rtol=1e-5)
    assert jnp.allclose(v_o, v_o_ref, atol=1e-5, rtol=1e-5)

    print("KERNEL_OK")
</pallas_src>

<mosaic_0001>
module attributes {stable_mosaic.version = 11 : i64} {
  func.func @actor_critic_kernel(%arg0: memref<8x8xf32, #tpu.memory_space<vmem>>, %arg1: memref<8x256xf32, #tpu.memory_space<vmem>>, %arg2: memref<256x8xf32, #tpu.memory_space<vmem>>, %arg3: memref<2x256xf32, #tpu.memory_space<vmem>>, %arg4: memref<8x8xf32, #tpu.memory_space<vmem>>) attributes {dimension_semantics = [], scalar_prefetch = 0 : i64, scratch_operands = 0 : i64, tpu.core_type = #tpu.core_type<tc>} {
    %c0 = arith.constant 0 : index
    %c0_0 = arith.constant 0 : index
    %0 = vector.load %arg0[%c0, %c0_0] : memref<8x8xf32, #tpu.memory_space<vmem>>, vector<8x8xf32>
    %c0_1 = arith.constant 0 : index
    %c0_2 = arith.constant 0 : index
    %1 = vector.load %arg3[%c0_1, %c0_2] : memref<2x256xf32, #tpu.memory_space<vmem>>, vector<1x256xf32>
    %c1 = arith.constant 1 : index
    %c0_3 = arith.constant 0 : index
    %2 = vector.load %arg3[%c1, %c0_3] : memref<2x256xf32, #tpu.memory_space<vmem>>, vector<1x8xf32>
    %c0_4 = arith.constant 0 : index
    %c0_5 = arith.constant 0 : index
    %3 = vector.load %arg1[%c0_4, %c0_5] : memref<8x256xf32, #tpu.memory_space<vmem>>, vector<8x256xf32>
    %cst = arith.constant dense<0.000000e+00> : vector<8x256xf32>
    %4 = tpu.matmul %0, %3, %cst {dimension_numbers = #tpu.dot_dimension_numbers<[1], [0], [0], [1], [0, 0, 1, 1], [], []>} : vector<8x8xf32>, vector<8x256xf32>, vector<8x256xf32> -> vector<8x256xf32>
    %5 = vector.broadcast %1 : vector<1x256xf32> to vector<8x256xf32>
    %6 = arith.addf %4, %5 : vector<8x256xf32>
    %cst_6 = arith.constant 0.000000e+00 : f32
    %7 = vector.broadcast %cst_6 : f32 to vector<8x256xf32>
    %8 = arith.maximumf %6, %7 : vector<8x256xf32>
    %c0_7 = arith.constant 0 : index
    %c0_8 = arith.constant 0 : index
    %9 = vector.load %arg2[%c0_7, %c0_8] : memref<256x8xf32, #tpu.memory_space<vmem>>, vector<256x8xf32>
    %cst_9 = arith.constant dense<0.000000e+00> : vector<8x8xf32>
    %10 = tpu.matmul %8, %9, %cst_9 {dimension_numbers = #tpu.dot_dimension_numbers<[1], [0], [0], [1], [0, 0, 1, 1], [], []>} : vector<8x256xf32>, vector<256x8xf32>, vector<8x8xf32> -> vector<8x8xf32>
    %11 = vector.broadcast %2 : vector<1x8xf32> to vector<8x8xf32>
    %12 = arith.addf %10, %11 : vector<8x8xf32>
    %c0_10 = arith.constant 0 : index
    %c0_11 = arith.constant 0 : index
    %13 = vector.load %arg4[%c0_10, %c0_11] : memref<8x8xf32, #tpu.memory_space<vmem>>, vector<8x8xf32>
    tpu.vector_store %arg4[%c0_10, %c0_11], %12 {strides = array<i32>} : memref<8x8xf32, #tpu.memory_space<vmem>>, vector<8x8xf32>,
    return
  }
}

</mosaic_0001>

<bundles_post_ra>
// kernel: tpu_custom_call.1
= control target key start
LH: loop header
LB: loop body
LE: loop exit
PB: predicated region body
PF: predicated region fallthrough
CT: control target
= control target key end

     0   :  { %vm34_vm0 = vcmask 64512   ;;  %v327_v3 = vmov 0.0   ;;  %s479_s0 = inlined_call_operand.vmem [shape: f32[8,8], index: 0, kind: input, shape index: {}]   ;;  %s480_s1 = inlined_call_operand.vmem [shape: f32[8,256], index: 1, kind: input, shape index: {}]   ;;  %s481_s2 = inlined_call_operand.vmem [shape: f32[256,8], index: 2, kind: input, shape index: {}]   ;;  %s482_s3 = inlined_call_operand.vmem [shape: f32[2,256], index: 3, kind: input, shape index: {}]   ;;  %s483_s4 = inlined_call_operand.hbm [shape: f32[8,8], index: 4, kind: output, shape index: {}]  }
   0x1   :  { %v22_v0 = vld [vmem:[%s480_s1 + $0x8] sm:$0xff]  ;;  %v21_v1 = vld [vmem:[%s480_s1] sm:$0xff]  ;;  %102 = vmatprep.mubr.f32.mxu0 %v327_v3  ;;  %v129_v9 = vld [vmem:[%s481_s2 + $0x90] sm:$0xff] }
   0x2   :  { %v18_v2 = vld [vmem:[%s479_s0] sm:$0xff]  ;;  %38 = vmatprep.subr.mxu0 %v22_v0  ;;  %v128_v5 = vld [vmem:[%s481_s2 + $0x88] sm:$0xff]  ;;  %v130_v10 = vld [vmem:[%s481_s2 + $0x98] sm:$0xff] }
   0x3   :  { %v127_v4 = vld [vmem:[%s481_s2 + $0x80] sm:$0xff]  ;;  %39 = vmatpush1.msra.mxu0 %v21_v1  ;;  %v112_v8 = vld [vmem:[%s481_s2 + $0x8] sm:$0xff]  ;;  %v273_v12 = vpack.c.bf16 %v130_v10, %v129_v9  ;;  %v113_v13 = vld [vmem:[%s481_s2 + $0x10] sm:$0xff] }
   0x4   :  { %v111_v6 = vld [vmem:[%s481_s2] sm:$0xff]  ;;  %v269_v7 = vpack.c.bf16 %v128_v5, %v127_v4  ;;  %232 = vmatmul.mubr.msk.f32.vlgmr.msra.gmra.mrb[0].mxu0 %vm34_vm0, %v18_v2  ;;  %v114_v14 = vld [vmem:[%s481_s2 + $0x18] sm:$0xff]  ;;  %v132_v16 = vld [vmem:[%s481_s2 + $0xa8] sm:$0xff] }
   0x5   :  { %v271_v11 = vpack.c.bf16 %v112_v8, %v111_v6  ;;  %v131_v15 = vld [vmem:[%s481_s2 + $0xa0] sm:$0xff]  ;;  %v275_v17 = vpack.c.bf16 %v114_v14, %v113_v13  ;;  %v116_v20 = vld [vmem:[%s481_s2 + $0x28] sm:$0xff]  ;;  %v133_v21 = vld [vmem:[%s481_s2 + $0xb0] sm:$0xff] }
   0x6   :  { %270 = vmatprep.subr.bf16.mxu1 %v269_v7  ;;  %v277_v18 = vpack.c.bf16 %v132_v16, %v131_v15  ;;  %v115_v19 = vld [vmem:[%s481_s2 + $0x20] sm:$0xff]  ;;  %v134_v22 = vld [vmem:[%s481_s2 + $0xb8] sm:$0xff]  ;;  %v117_v25 = vld [vmem:[%s481_s2 + $0x30] sm:$0xff] }
   0x7   :  { %272 = vmatpush3.bf16.msra.mxu1 %v271_v11  ;;  %v279_v23 = vpack.c.bf16 %v116_v20, %v115_v19  ;;  %v281_v24 = vpack.c.bf16 %v134_v22, %v133_v21  ;;  %v118_v26 = vld [vmem:[%s481_s2 + $0x38] sm:$0xff] }
   0x8   :  { %274 = vmatprep.subr.bf16.mxu1 %v273_v12 }
   0xb   :  { %276 = vmatpush3.bf16.msra.mxu1 %v275_v17 }
   0xc   :  { %278 = vmatprep.subr.bf16.mxu1 %v277_v18 }
   0xd   :  { %9 = vsyncpa [#allocation3], 0  ;;  %v135_v27 = vld [vmem:[%s481_s2 + $0xc0] sm:$0xff]  ;;  %v136_v28 = vld [vmem:[%s481_s2 + $0xc8] sm:$0xff]  ;;  %v283_v29 = vpack.c.bf16 %v118_v26, %v117_v25  ;;  %v24_v52 = vlaneseq  ;;  %s328_s30 = smov [#allocation2]  }
   0xe   :  { %v285_v30 = vpack.c.bf16 %v136_v28, %v135_v27  ;;  %v119_v31 = vld [vmem:[%s481_s2 + $0x40] sm:$0xff]  ;;  %v120_v32 = vld [vmem:[%s481_s2 + $0x48] sm:$0xff]  ;;  %v137_v33 = vld [vmem:[%s481_s2 + $0xd0] sm:$0xff]  ;;  %s224_s5 = sshll.u32 %s328_s30, 4  ;;  %s225_s5 = int_to_ptr.vmem [resolvable:$true] %s224_s5 }
   0xf   :  { %280 = vmatpush3.bf16.msra.mxu1 %v279_v23  ;;  %v138_v34 = vld [vmem:[%s481_s2 + $0xd8] sm:$0xff]  ;;  %v287_v35 = vpack.c.bf16 %v120_v32, %v119_v31  ;;  %v121_v37 = vld [vmem:[%s481_s2 + $0x50] sm:$0xff]  ;;  %v139_v39 = vld [vmem:[%s481_s2 + $0xe0] sm:$0xff]  ;;  %v25_v53 = vshrl.u32 %v24_v52, 7  ;;  %s303_s6 = scalar_lea.vmem %s225_s5, 128  ;;  %p308_p1 = scmp.lt.s32.totalorder %s225_s5, %s225_s5 }
  0x10   :  { %282 = vmatprep.subr.bf16.mxu1 %v281_v24  ;;  %v289_v36 = vpack.c.bf16 %v138_v34, %v137_v33  ;;  %v122_v38 = vld [vmem:[%s481_s2 + $0x58] sm:$0xff]  ;;  %v140_v40 = vld [vmem:[%s481_s2 + $0xe8] sm:$0xff]  ;;  %v123_v43 = vld [vmem:[%s481_s2 + $0x60] sm:$0xff]  ;;  %p304_p0 = scmp.ne.s32.totalorder %s225_s5, %s303_s6  ;;  %p309_p2 = scmp.lt.s32.totalorder %s303_s6, %s303_s6 }
  0x11   :  { %v291_v41 = vpack.c.bf16 %v122_v38, %v121_v37  ;;  %v293_v42 = vpack.c.bf16 %v140_v40, %v139_v39  ;;  %v124_v44 = vld [vmem:[%s481_s2 + $0x68] sm:$0xff]  ;;  %v141_v46 = vld [vmem:[%s481_s2 + $0xf0] sm:$0xff]  ;;  %v142_v47 = vld [vmem:[%s481_s2 + $0xf8] sm:$0xff]  ;;  %v26_v54 = vsub.s32 0, %v25_v53  ;;  %v30_v56 = vsub.s32 1, %v25_v53 }
  0x12   :  { %v295_v45 = vpack.c.bf16 %v124_v44, %v123_v43  ;;  %v297_v48 = vpack.c.bf16 %v142_v47, %v141_v46  ;;  %v125_v49 = vld [vmem:[%s481_s2 + $0x70] sm:$0xff]  ;;  %v126_v50 = vld [vmem:[%s481_s2 + $0x78] sm:$0xff]  ;;  %v19_v55 = vld [vmem:[%s482_s3] ss:$2 sm:$0x3]  ;;  %p310_p3 = por %p309_p2, %p308_p1 }
  0x13   :  { %284 = vmatpush3.bf16.msra.mxu1 %v283_v29  ;;  %v299_v51 = vpack.c.bf16 %v126_v50, %v125_v49  ;;  %v27_v57 = vrot.slane %v19_v55, %v26_v54  ;;  %v31_v58 = vrot.slane %v19_v55, %v30_v56  ;;  %v233_v2 = vld [vmem:[%s482_s3 + $0x1] ss:$0 sm:$0xff] }
  0x14   :  { %286 = vmatprep.subr.bf16.mxu1 %v285_v30  ;;  %p311_p4 = pnand %p310_p3, %p304_p0 }
  0x17   :  { %288 = vmatpush3.bf16.msra.mxu1 %v287_v35 }
  0x18   :  { %290 = vmatprep.subr.bf16.mxu1 %v289_v36 }
  0x1b   :  { %292 = vmatpush3.bf16.msra.mxu1 %v291_v41 }
  0x1c   :  { %294 = vmatprep.subr.bf16.mxu1 %v293_v42 }
  0x1f   :  { %296 = vmatpush3.bf16.msra.mxu1 %v295_v45 }
  0x20   :  { %298 = vmatprep.subr.bf16.mxu1 %v297_v48 }
  0x23   :  { %300 = vmatpush3.bf16.msra.mxu1 %v299_v51 }
  0xd7   :  { %v104_v59 = vpop.f32.mrb[0].mxu0 }
  0xd8   :  { %v105_v60 = vadd.f32 %v104_v59, %v27_v57  ;;  %v106_v61 = vpop.f32.mrb[1].mxu0 }
  0xd9   :  { %v107_v62 = vadd.f32 %v106_v61, %v31_v58 }
  0xda   :  { %v109_v0 = vmax.f32 %v105_v60, 0.0 }
  0xdb   :  { %v110_v63 = vmax.f32 %v107_v62, 0.0 }
  0xdd   :  { %211 = vmatprep.mubr.f32.mxu1 %v110_v63 }
  0xde   :  { %212 = vmatmul.mubr.f32.vlgmr.msra.gmra.mrb[0].mxu1 %v109_v0 }
 0x1b1   :  { %v266_v1 = vpop.f32.mrb[0].mxu1 }
 0x1b2   :  { %v267_v3 = vpop.f32.mrb[1].mxu1 }
 0x1b3   :  { %v268_v4 = vadd.f32 %v267_v3, %v266_v1 }
 0x1b5   :  { %v214_v5 = vadd.f32 %v268_v4, %v233_v2 }
 0x1b7   :  { %217 = vst.msk [vmem:[#allocation2] sm:$0xff] %vm34_vm0, %v214_v5 }
 0x1b8   :  { %314 = shalt.err (!%p311_p4)
}
 0x1b9   :  { %s315_s9 = scalar_lea.hbm %s483_s4, 128 }
 0x1ba   :  { %p316_p5 = scmp.ne.s32.totalorder %s483_s4, %s315_s9  ;;  %p319_p6 = scmp.lt.u32.totalorder %s315_s9, %s483_s4 }
 0x1bc   :  { %p321_p7 = pnand %p319_p6, %p316_p5 }
 0x1be   :  { %324 = shalt.err (!%p321_p7)
}
 0x1bf   :  { %227 = dma.vmem_to_hbm [thread:$0]  %s225_s5, 128, %s483_s4, [#allocation3]  }
 0x1c0   :  { %325 = dma.done.wait [#allocation3], 128  }
 0x1c1   :  { %326 = vsyncadd [#allocation3], 4294967168 }
 0x1c2   :  { %231 = vsyncpa [#allocation3], 1 }

</bundles_post_ra>
